<compile_context>
chip_gen: v6e
topology: v6e:2x2x1
jax: 0.10.0
libtpu: 0.0.40
codegen_flags: <defaults>
</compile_context>

<pallas_src>
import jax
import jax.numpy as jnp
import numpy as np
from jax.experimental import pallas as pl
from jax.experimental.pallas import tpu as pltpu

VMEM = pltpu.MemorySpace.VMEM
HIGH = jax.lax.Precision.HIGHEST


# ---------------------------------------------------------------------------
# Offline weight preprocessing (done once, outside the jitted forward).
# Convolution is linear, so each conv / transposed-conv layer is folded into an
# exact dense matrix on the channel-major flattened activation vector (the same
# ordering PyTorch's .view(B, -1) uses).
# ---------------------------------------------------------------------------

def conv_to_matrix(w, in_hw, stride, pad):
    """Conv2d(Cin->Cout, k, stride, pad) as a (Cin*H*W, Cout*Ho*Wo) matrix."""
    cout, cin, K, _ = w.shape
    H = W = in_hw
    Ho = Wo = (H + 2 * pad - K) // stride + 1
    rows, cols, widx = [], [], []
    for co in range(cout):
        for ci in range(cin):
            for kh in range(K):
                for kw in range(K):
                    for oh in range(Ho):
                        ih = stride * oh + kh - pad
                        if not 0 <= ih < H:
                            continue
                        for ow in range(Wo):
                            iw = stride * ow + kw - pad
                            if not 0 <= iw < W:
                                continue
                            rows.append(ci * H * W + ih * W + iw)
                            cols.append(co * Ho * Wo + oh * Wo + ow)
                            widx.append(((co * cin + ci) * K + kh) * K + kw)
    m = jnp.zeros((cin * H * W, cout * Ho * Wo), jnp.float32)
    vals = w.reshape(-1)[np.asarray(widx)]
    return m.at[np.asarray(rows), np.asarray(cols)].add(vals)


def convT_to_matrix(w, in_hw, stride, pad, out_pad):
    """ConvTranspose2d(Cin->Cout, k, stride, pad, out_pad) as a dense matrix.

    PyTorch scatter form: x[ci, ih, iw] * w[ci, co, kh, kw] lands at output
    position (stride*ih + kh - pad, stride*iw + kw - pad) when in bounds.
    """
    cin, cout, K, _ = w.shape
    H = W = in_hw
    Ho = Wo = (H - 1) * stride - 2 * pad + K + out_pad
    rows, cols, widx = [], [], []
    for ci in range(cin):
        for co in range(cout):
            for kh in range(K):
                for kw in range(K):
                    for ih in range(H):
                        oh = stride * ih + kh - pad
                        if not 0 <= oh < Ho:
                            continue
                        for iw in range(W):
                            ow = stride * iw + kw - pad
                            if not 0 <= ow < Wo:
                                continue
                            rows.append(ci * H * W + ih * W + iw)
                            cols.append(co * Ho * Wo + oh * Wo + ow)
                            widx.append(((ci * cout + co) * K + kh) * K + kw)
    m = jnp.zeros((cin * H * W, cout * Ho * Wo), jnp.float32)
    vals = w.reshape(-1)[np.asarray(widx)]
    return m.at[np.asarray(rows), np.asarray(cols)].add(vals)


def prepare_params(p):
    """One-time repack of PyTorch-layout params into fused-kernel operands."""
    # Encoder convs (16x16 -> 8x8 -> 4x4).
    m1 = conv_to_matrix(p["c1_w"], 16, 2, 1)                       # (256, 128)
    bv1 = jnp.repeat(p["c1_b"], 64)[None, :]                       # (1, 128)
    m2 = conv_to_matrix(p["c2_w"], 8, 2, 1)                        # (128, 64)
    bv2 = jnp.repeat(p["c2_b"], 16)[None, :]                       # (1, 64)
    # Decoder transposed convs (4x4 -> 8x8 -> 16x16).
    m3 = convT_to_matrix(p["t1_w"], 4, 2, 1, 1)                    # (64, 128)
    bv3 = jnp.repeat(p["t1_b"], 64)[None, :]                       # (1, 128)
    m4 = convT_to_matrix(p["t2_w"], 8, 2, 1, 1)                    # (128, 256)
    bv4 = jnp.repeat(p["t2_b"], 256)[None, :]                      # (1, 256)

    # Linear layers, pre-transposed to (in, out).
    el1w, el1b = p["el1_w"].T, p["el1_b"][None, :]
    el2w, el2b = p["el2_w"].T, p["el2_b"][None, :]
    dl1w, dl1b = p["dl1_w"].T, p["dl1_b"][None, :]
    dl2w, dl2b = p["dl2_w"].T, p["dl2_b"][None, :]

    # No nonlinearity between conv2 and enc_linear[0], nor between dec_linear[2]
    # and deconv1 -> pre-multiply the linear pairs (exact).
    me = jnp.dot(m2, el1w, precision=HIGH)                         # (128, 32)
    be = jnp.dot(bv2, el1w, precision=HIGH) + el1b                 # (1, 32)
    md = jnp.dot(dl2w, m3, precision=HIGH)                         # (32, 128)
    bd = jnp.dot(dl2b, m3, precision=HIGH) + bv3                   # (1, 128)

    return dict(m1=m1, bv1=bv1, me=me, be=be, el2w=el2w, el2b=el2b,
                dl1w=dl1w, dl1b=dl1b, md=md, bd=bd, m4=m4, bv4=bv4)


# ---------------------------------------------------------------------------
# The single fused kernel: encoder -> enc_linear -> reparameterize ->
# dec_linear -> decoder.  6 MXU matmuls, everything VMEM-resident.
# ---------------------------------------------------------------------------

def _vae_fused_kernel(x_ref, eps_ref,
                      m1_ref, bv1_ref, me_ref, be_ref, el2w_ref, el2b_ref,
                      dl1w_ref, dl1b_ref, md_ref, bd_ref, m4_ref, bv4_ref,
                      out_ref, mulv_ref):
    f32 = jnp.float32
    x = x_ref[...]                                                  # (B, 256)

    # conv1 (1->2, k3 s2 p1) + ReLU, folded to a (256,128) matmul.
    h1 = jnp.maximum(
        jnp.dot(x, m1_ref[...], preferred_element_type=f32) + bv1_ref[...], 0.0)
    # conv2 (2->4) fused with enc_linear[0] (64->32) + ReLU.
    a = jnp.maximum(
        jnp.dot(h1, me_ref[...], preferred_element_type=f32) + be_ref[...], 0.0)
    # enc_linear[2] (32->4): columns 0:2 = mu, 2:4 = logvar.
    e = jnp.dot(a, el2w_ref[...], preferred_element_type=f32) + el2b_ref[...]
    mu = e[:, 0:2]
    lv = e[:, 2:4]

    # reparameterize: z = mu + eps * exp(logvar / 2)
    z = mu + eps_ref[...] * jnp.exp(lv * 0.5)                       # (B, 2)

    # dec_linear[0] (2->32) + ReLU as two VPU broadcast-FMAs (K=2: skip the MXU).
    d1 = jnp.maximum(
        z[:, 0:1] * dl1w_ref[0:1, :] + z[:, 1:2] * dl1w_ref[1:2, :]
        + dl1b_ref[...], 0.0)                                       # (B, 32)
    # dec_linear[2] (32->64) fused with deconv1 (4->2, k3 s2 p1 op1) + ReLU.
    t1 = jnp.maximum(
        jnp.dot(d1, md_ref[...], preferred_element_type=f32) + bd_ref[...], 0.0)
    # deconv2 (2->1), output as the flattened 16x16 image (lane-dense, 2x128).
    out_ref[...] = (jnp.dot(t1, m4_ref[...], preferred_element_type=f32)
                    + bv4_ref[...])                                 # (B, 256)
    mulv_ref[...] = e                                               # (B, 4) mu|logvar


def vae_forward(x, prep, eps):
    B = x.shape[0]
    assert x.shape[1:] == (1, 16, 16), "folded operators assume 1x16x16 input"
    xf = x.reshape(B, 256)
    out_flat, mulv = pl.pallas_call(
        _vae_fused_kernel,
        out_shape=(jax.ShapeDtypeStruct((B, 256), jnp.float32),
                   jax.ShapeDtypeStruct((B, 4), jnp.float32)),
        in_specs=[pl.BlockSpec(memory_space=VMEM)] * 14,
        out_specs=(pl.BlockSpec(memory_space=VMEM),
                   pl.BlockSpec(memory_space=VMEM)),
    )(xf, eps,
      prep["m1"], prep["bv1"], prep["me"], prep["be"],
      prep["el2w"], prep["el2b"], prep["dl1w"], prep["dl1b"],
      prep["md"], prep["bd"], prep["m4"], prep["bv4"])
    out = out_flat.reshape(B, 1, 16, 16)
    return out, mulv[:, 0:2], mulv[:, 2:4]


# ---------------------------------------------------------------------------
# Params + pure-JAX reference (mirrors the PyTorch module) for validation.
# ---------------------------------------------------------------------------

def init_params(latent_dim, key):
    """PyTorch-style uniform(-1/sqrt(fan_in), 1/sqrt(fan_in)) init."""
    ks = jax.random.split(key, 16)

    def u(k, shape, fan_in):
        bound = 1.0 / float(fan_in) ** 0.5
        return jax.random.uniform(k, shape, jnp.float32, -bound, bound)

    h = latent_dim // 2
    return {
        "c1_w": u(ks[0], (2, 1, 3, 3), 1 * 9), "c1_b": u(ks[1], (2,), 1 * 9),
        "c2_w": u(ks[2], (4, 2, 3, 3), 2 * 9), "c2_b": u(ks[3], (4,), 2 * 9),
        "el1_w": u(ks[4], (h, latent_dim), latent_dim), "el1_b": u(ks[5], (h,), latent_dim),
        "el2_w": u(ks[6], (4, h), h),                   "el2_b": u(ks[7], (4,), h),
        "dl1_w": u(ks[8], (h, 2), 2),                   "dl1_b": u(ks[9], (h,), 2),
        "dl2_w": u(ks[10], (latent_dim, h), h),         "dl2_b": u(ks[11], (latent_dim,), h),
        "t1_w": u(ks[12], (4, 2, 3, 3), 4 * 9), "t1_b": u(ks[13], (2,), 4 * 9),
        "t2_w": u(ks[14], (2, 1, 3, 3), 2 * 9), "t2_b": u(ks[15], (1,), 2 * 9),
    }


def vae_reference(x, p, eps):
    dn = ("NCHW", "OIHW", "NCHW")

    def conv(x, w, b, s):
        y = jax.lax.conv_general_dilated(x, w, (s, s), ((1, 1), (1, 1)),
                                         dimension_numbers=dn, precision=HIGH)
        return y + b.reshape(1, -1, 1, 1)

    def convT(x, w, b, s=2, pad=1, op=1):
        K = w.shape[2]
        wf = jnp.flip(w, axis=(2, 3)).transpose(1, 0, 2, 3)
        lo, hi = K - 1 - pad, K - 1 - pad + op
        y = jax.lax.conv_general_dilated(x, wf, (1, 1), ((lo, hi), (lo, hi)),
                                         lhs_dilation=(s, s),
                                         dimension_numbers=dn, precision=HIGH)
        return y + b.reshape(1, -1, 1, 1)

    B = x.shape[0]
    h = jnp.maximum(conv(x, p["c1_w"], p["c1_b"], 2), 0.0)
    h = conv(h, p["c2_w"], p["c2_b"], 2)
    latent_shape = h.shape
    h = h.reshape(B, -1)
    h = jnp.maximum(jnp.dot(h, p["el1_w"].T, precision=HIGH) + p["el1_b"], 0.0)
    h = jnp.dot(h, p["el2_w"].T, precision=HIGH) + p["el2_b"]
    mu, logvar = h[:, :2], h[:, 2:]
    z = mu + eps * jnp.exp(logvar / 2)
    z = jnp.maximum(jnp.dot(z, p["dl1_w"].T, precision=HIGH) + p["dl1_b"], 0.0)
    z = jnp.dot(z, p["dl2_w"].T, precision=HIGH) + p["dl2_b"]
    z = z.reshape(latent_shape)
    o = jnp.maximum(convT(z, p["t1_w"], p["t1_b"]), 0.0)
    o = convT(o, p["t2_w"], p["t2_b"])
    return o, mu, logvar


if __name__ == "__main__":
    B, H, W = 2, 16, 16
    latent_dim = 4 * (H // 4) * (W // 4)          # 64 (required by the view/Linear)

    key = jax.random.PRNGKey(0)
    k_x, k_eps, k_p = jax.random.split(key, 3)
    x = jax.random.normal(k_x, (B, 1, H, W), jnp.float32)
    # epsilon of reparameterize drawn in glue (torch.randn_like equivalent)
    eps = jax.random.normal(k_eps, (B, 2), jnp.float32)
    params = init_params(latent_dim, k_p)

    prep = prepare_params(params)                 # one-time weight repack
    fwd = jax.jit(vae_forward)
    out, mu, logvar = fwd(x, prep, eps)
    jax.block_until_ready((out, mu, logvar))

    assert out.shape == (B, 1, H, W), out.shape
    assert mu.shape == (B, 2) and logvar.shape == (B, 2)

    # Correctness check against the pure-JAX/XLA reference of the PyTorch module.
    out_r, mu_r, lv_r = jax.jit(vae_reference)(x, params, eps)
    np.testing.assert_allclose(np.asarray(mu), np.asarray(mu_r), rtol=1e-4, atol=1e-4)
    np.testing.assert_allclose(np.asarray(logvar), np.asarray(lv_r), rtol=1e-4, atol=1e-4)
    np.testing.assert_allclose(np.asarray(out), np.asarray(out_r), rtol=1e-4, atol=1e-4)

    print("KERNEL_OK")
</pallas_src>

<mosaic_0001>
module attributes {stable_mosaic.version = 11 : i64} {
  func.func @_vae_fused_kernel(%arg0: memref<2x256xf32, #tpu.memory_space<vmem>>, %arg1: memref<2x2xf32, #tpu.memory_space<vmem>>, %arg2: memref<256x128xf32, #tpu.memory_space<vmem>>, %arg3: memref<1x128xf32, #tpu.memory_space<vmem>>, %arg4: memref<128x32xf32, #tpu.memory_space<vmem>>, %arg5: memref<1x32xf32, #tpu.memory_space<vmem>>, %arg6: memref<32x4xf32, #tpu.memory_space<vmem>>, %arg7: memref<1x4xf32, #tpu.memory_space<vmem>>, %arg8: memref<2x32xf32, #tpu.memory_space<vmem>>, %arg9: memref<1x32xf32, #tpu.memory_space<vmem>>, %arg10: memref<32x128xf32, #tpu.memory_space<vmem>>, %arg11: memref<1x128xf32, #tpu.memory_space<vmem>>, %arg12: memref<128x256xf32, #tpu.memory_space<vmem>>, %arg13: memref<1x256xf32, #tpu.memory_space<vmem>>, %arg14: memref<2x256xf32, #tpu.memory_space<vmem>>, %arg15: memref<2x4xf32, #tpu.memory_space<vmem>>) attributes {dimension_semantics = [], scalar_prefetch = 0 : i64, scratch_operands = 0 : i64, tpu.core_type = #tpu.core_type<tc>} {
    %c0 = arith.constant 0 : index
    %c0_0 = arith.constant 0 : index
    %0 = vector.load %arg0[%c0, %c0_0] : memref<2x256xf32, #tpu.memory_space<vmem>>, vector<2x256xf32>
    %c0_1 = arith.constant 0 : index
    %c0_2 = arith.constant 0 : index
    %1 = vector.load %arg2[%c0_1, %c0_2] : memref<256x128xf32, #tpu.memory_space<vmem>>, vector<256x128xf32>
    %cst = arith.constant dense<0.000000e+00> : vector<2x128xf32>
    %2 = tpu.matmul %0, %1, %cst {dimension_numbers = #tpu.dot_dimension_numbers<[1], [0], [0], [1], [0, 0, 1, 1], [], []>} : vector<2x256xf32>, vector<256x128xf32>, vector<2x128xf32> -> vector<2x128xf32>
    %c0_3 = arith.constant 0 : index
    %c0_4 = arith.constant 0 : index
    %3 = vector.load %arg3[%c0_3, %c0_4] : memref<1x128xf32, #tpu.memory_space<vmem>>, vector<1x128xf32>
    %4 = vector.broadcast %3 : vector<1x128xf32> to vector<2x128xf32>
    %5 = arith.addf %2, %4 : vector<2x128xf32>
    %cst_5 = arith.constant 0.000000e+00 : f32
    %6 = vector.broadcast %cst_5 : f32 to vector<2x128xf32>
    %7 = arith.maximumf %5, %6 : vector<2x128xf32>
    %c0_6 = arith.constant 0 : index
    %c0_7 = arith.constant 0 : index
    %8 = vector.load %arg4[%c0_6, %c0_7] : memref<128x32xf32, #tpu.memory_space<vmem>>, vector<128x32xf32>
    %cst_8 = arith.constant dense<0.000000e+00> : vector<2x32xf32>
    %9 = tpu.matmul %7, %8, %cst_8 {dimension_numbers = #tpu.dot_dimension_numbers<[1], [0], [0], [1], [0, 0, 1, 1], [], []>} : vector<2x128xf32>, vector<128x32xf32>, vector<2x32xf32> -> vector<2x32xf32>
    %c0_9 = arith.constant 0 : index
    %c0_10 = arith.constant 0 : index
    %10 = vector.load %arg5[%c0_9, %c0_10] : memref<1x32xf32, #tpu.memory_space<vmem>>, vector<1x32xf32>
    %11 = vector.broadcast %10 : vector<1x32xf32> to vector<2x32xf32>
    %12 = arith.addf %9, %11 : vector<2x32xf32>
    %cst_11 = arith.constant 0.000000e+00 : f32
    %13 = vector.broadcast %cst_11 : f32 to vector<2x32xf32>
    %14 = arith.maximumf %12, %13 : vector<2x32xf32>
    %c0_12 = arith.constant 0 : index
    %c0_13 = arith.constant 0 : index
    %15 = vector.load %arg6[%c0_12, %c0_13] : memref<32x4xf32, #tpu.memory_space<vmem>>, vector<32x4xf32>
    %cst_14 = arith.constant dense<0.000000e+00> : vector<2x4xf32>
    %16 = tpu.matmul %14, %15, %cst_14 {dimension_numbers = #tpu.dot_dimension_numbers<[1], [0], [0], [1], [0, 0, 1, 1], [], []>} : vector<2x32xf32>, vector<32x4xf32>, vector<2x4xf32> -> vector<2x4xf32>
    %c0_15 = arith.constant 0 : index
    %c0_16 = arith.constant 0 : index
    %17 = vector.load %arg7[%c0_15, %c0_16] : memref<1x4xf32, #tpu.memory_space<vmem>>, vector<1x4xf32>
    %18 = vector.broadcast %17 : vector<1x4xf32> to vector<2x4xf32>
    %19 = arith.addf %16, %18 : vector<2x4xf32>
    %20 = vector.extract_strided_slice %19 {offsets = [0, 0], sizes = [2, 2], strides = [1, 1]} : vector<2x4xf32> to vector<2x2xf32>
    %21 = vector.extract_strided_slice %19 {offsets = [0, 2], sizes = [2, 2], strides = [1, 1]} : vector<2x4xf32> to vector<2x2xf32>
    %c0_17 = arith.constant 0 : index
    %c0_18 = arith.constant 0 : index
    %22 = vector.load %arg1[%c0_17, %c0_18] : memref<2x2xf32, #tpu.memory_space<vmem>>, vector<2x2xf32>
    %cst_19 = arith.constant 5.000000e-01 : f32
    %23 = vector.broadcast %cst_19 : f32 to vector<2x2xf32>
    %24 = arith.mulf %21, %23 : vector<2x2xf32>
    %25 = math.exp %24 : vector<2x2xf32>
    %26 = arith.mulf %22, %25 : vector<2x2xf32>
    %27 = arith.addf %20, %26 : vector<2x2xf32>
    %28 = vector.extract_strided_slice %27 {offsets = [0, 0], sizes = [2, 1], strides = [1, 1]} : vector<2x2xf32> to vector<2x1xf32>
    %c0_20 = arith.constant 0 : index
    %c0_21 = arith.constant 0 : index
    %29 = vector.load %arg8[%c0_20, %c0_21] : memref<2x32xf32, #tpu.memory_space<vmem>>, vector<1x32xf32>
    %30 = vector.broadcast %28 : vector<2x1xf32> to vector<2x32xf32>
    %31 = vector.broadcast %29 : vector<1x32xf32> to vector<2x32xf32>
    %32 = arith.mulf %30, %31 : vector<2x32xf32>
    %33 = vector.extract_strided_slice %27 {offsets = [0, 1], sizes = [2, 1], strides = [1, 1]} : vector<2x2xf32> to vector<2x1xf32>
    %c1 = arith.constant 1 : index
    %c0_22 = arith.constant 0 : index
    %34 = vector.load %arg8[%c1, %c0_22] : memref<2x32xf32, #tpu.memory_space<vmem>>, vector<1x32xf32>
    %35 = vector.broadcast %33 : vector<2x1xf32> to vector<2x32xf32>
    %36 = vector.broadcast %34 : vector<1x32xf32> to vector<2x32xf32>
    %37 = arith.mulf %35, %36 : vector<2x32xf32>
    %38 = arith.addf %32, %37 : vector<2x32xf32>
    %c0_23 = arith.constant 0 : index
    %c0_24 = arith.constant 0 : index
    %39 = vector.load %arg9[%c0_23, %c0_24] : memref<1x32xf32, #tpu.memory_space<vmem>>, vector<1x32xf32>
    %40 = vector.broadcast %39 : vector<1x32xf32> to vector<2x32xf32>
    %41 = arith.addf %38, %40 : vector<2x32xf32>
    %cst_25 = arith.constant 0.000000e+00 : f32
    %42 = vector.broadcast %cst_25 : f32 to vector<2x32xf32>
    %43 = arith.maximumf %41, %42 : vector<2x32xf32>
    %c0_26 = arith.constant 0 : index
    %c0_27 = arith.constant 0 : index
    %44 = vector.load %arg10[%c0_26, %c0_27] : memref<32x128xf32, #tpu.memory_space<vmem>>, vector<32x128xf32>
    %cst_28 = arith.constant dense<0.000000e+00> : vector<2x128xf32>
    %45 = tpu.matmul %43, %44, %cst_28 {dimension_numbers = #tpu.dot_dimension_numbers<[1], [0], [0], [1], [0, 0, 1, 1], [], []>} : vector<2x32xf32>, vector<32x128xf32>, vector<2x128xf32> -> vector<2x128xf32>
    %c0_29 = arith.constant 0 : index
    %c0_30 = arith.constant 0 : index
    %46 = vector.load %arg11[%c0_29, %c0_30] : memref<1x128xf32, #tpu.memory_space<vmem>>, vector<1x128xf32>
    %47 = vector.broadcast %46 : vector<1x128xf32> to vector<2x128xf32>
    %48 = arith.addf %45, %47 : vector<2x128xf32>
    %cst_31 = arith.constant 0.000000e+00 : f32
    %49 = vector.broadcast %cst_31 : f32 to vector<2x128xf32>
    %50 = arith.maximumf %48, %49 : vector<2x128xf32>
    %c0_32 = arith.constant 0 : index
    %c0_33 = arith.constant 0 : index
    %51 = vector.load %arg12[%c0_32, %c0_33] : memref<128x256xf32, #tpu.memory_space<vmem>>, vector<128x256xf32>
    %cst_34 = arith.constant dense<0.000000e+00> : vector<2x256xf32>
    %52 = tpu.matmul %50, %51, %cst_34 {dimension_numbers = #tpu.dot_dimension_numbers<[1], [0], [0], [1], [0, 0, 1, 1], [], []>} : vector<2x128xf32>, vector<128x256xf32>, vector<2x256xf32> -> vector<2x256xf32>
    %c0_35 = arith.constant 0 : index
    %c0_36 = arith.constant 0 : index
    %53 = vector.load %arg13[%c0_35, %c0_36] : memref<1x256xf32, #tpu.memory_space<vmem>>, vector<1x256xf32>
    %54 = vector.broadcast %53 : vector<1x256xf32> to vector<2x256xf32>
    %55 = arith.addf %52, %54 : vector<2x256xf32>
    %c0_37 = arith.constant 0 : index
    %c0_38 = arith.constant 0 : index
    %56 = vector.load %arg14[%c0_37, %c0_38] : memref<2x256xf32, #tpu.memory_space<vmem>>, vector<2x256xf32>
    tpu.vector_store %arg14[%c0_37, %c0_38], %55 {strides = array<i32>} : memref<2x256xf32, #tpu.memory_space<vmem>>, vector<2x256xf32>,
    %c0_39 = arith.constant 0 : index
    %c0_40 = arith.constant 0 : index
    %57 = vector.load %arg15[%c0_39, %c0_40] : memref<2x4xf32, #tpu.memory_space<vmem>>, vector<2x4xf32>
    tpu.vector_store %arg15[%c0_39, %c0_40], %19 {strides = array<i32>} : memref<2x4xf32, #tpu.memory_space<vmem>>, vector<2x4xf32>,
    return
  }
}

</mosaic_0001>

<bundles_post_ra>
// kernel: vae_forward.1
= control target key start
LH: loop header
LB: loop body
LE: loop exit
PB: predicated region body
PF: predicated region fallthrough
CT: control target
= control target key end

     0   :  { %21 = vsyncpa [#allocation3], 0  ;;  %s1076_s0 = inlined_call_operand.vmem [shape: f32[2,256], index: 0, kind: input, shape index: {}]   ;;  %s1077_s1 = inlined_call_operand.vmem [shape: f32[2,2], index: 1, kind: input, shape index: {}]   ;;  %s1078_s2 = inlined_call_operand.hbm [shape: f32[256,128], index: 2, kind: input, shape index: {}]   ;;  %s1079_s3 = inlined_call_operand.vmem [shape: f32[1,128], index: 3, kind: input, shape index: {}]   ;;  %s1080_s4 = inlined_call_operand.vmem [shape: f32[128,32], index: 4, kind: input, shape index: {}]   ;;  %s1081_s5 = inlined_call_operand.vmem [shape: f32[1,32], index: 5, kind: input, shape index: {}]   ;;  %s1082_s6 = inlined_call_operand.vmem [shape: f32[32,4], index: 6, kind: input, shape index: {}]   ;;  %s1083_s7 = inlined_call_operand.vmem [shape: f32[1,4], index: 7, kind: input, shape index: {}]   ;;  %s1084_s8 = inlined_call_operand.vmem [shape: f32[2,32], index: 8, kind: input, shape index: {}]   ;;  %s1085_s9 = inlined_call_operand.vmem [shape: f32[1,32], index: 9, kind: input, shape index: {}]   ;;  %s1086_s10 = inlined_call_operand.vmem [shape: f32[32,128], index: 10, kind: input, shape index: {}]   ;;  %s1087_s11 = inlined_call_operand.vmem [shape: f32[1,128], index: 11, kind: input, shape index: {}]   ;;  %s1088_s12 = inlined_call_operand.hbm [shape: f32[128,256], index: 12, kind: input, shape index: {}]   ;;  %s1089_s13 = inlined_call_operand.vmem [shape: f32[1,256], index: 13, kind: input, shape index: {}]   ;;  %s1090_s14 = inlined_call_operand.vmem [shape: f32[2,256], index: 14, kind: output, shape index: {0}]   ;;  %s1091_s15 = inlined_call_operand.vmem [shape: f32[2,4], index: 15, kind: output, shape index: {1}]  }
   0x1   :  { %22 = vsyncpa [#allocation5], 0  ;;  %s833_s18 = smov [#allocation2]  }
   0x2   :  { %s32_s19 = sshll.u32 %s833_s18, 4  ;;  %s33_s19 = int_to_ptr.vmem [resolvable:$true] %s32_s19 }
   0x3   :  { %s797_s20 = scalar_lea.vmem %s33_s19, 4096  ;;  %p802_p1 = scmp.lt.s32.totalorder %s33_s19, %s33_s19 }
   0x4   :  { %p798_p0 = scmp.ne.s32.totalorder %s33_s19, %s797_s20  ;;  %p803_p2 = scmp.lt.s32.totalorder %s797_s20, %s797_s20 }
   0x6   :  { %p804_p3 = por %p803_p2, %p802_p1 }
   0x8   :  { %p805_p4 = pnand %p804_p3, %p798_p0 }
   0xa   :  { %808 = shalt.err (!%p805_p4)
}
   0xb   :  { %s834_s21 = smov 128   ;;  %s835_s22 = smov 8  }
   0xc   :  { %38 = dma.hbm_to_vmem [thread:$0]  %s1078_s2, 4096, %s33_s19, [#allocation3], %s834_s21, %s834_s21, %s835_s22  }
   0xd   :  { %s836_s25 = smov [#allocation4]  }
   0xe   :  { %s62_s26 = sshll.u32 %s836_s25, 4  ;;  %s63_s26 = int_to_ptr.vmem [resolvable:$true] %s62_s26 }
   0xf   :  { %s817_s27 = scalar_lea.vmem %s63_s26, 4096  ;;  %p822_p6 = scmp.lt.s32.totalorder %s63_s26, %s63_s26 }
  0x10   :  { %p818_p5 = scmp.ne.s32.totalorder %s63_s26, %s817_s27  ;;  %p823_p7 = scmp.lt.s32.totalorder %s817_s27, %s817_s27 }
  0x12   :  { %p824_p8 = por %p823_p7, %p822_p6 }
  0x14   :  { %p825_p9 = pnand %p824_p8, %p818_p5 }
  0x16   :  { %828 = shalt.err (!%p825_p9)
}
  0x17   :  { %s837_s28 = smov 256   ;;  %s838_s29 = smov 16  }
  0x18   :  { %68 = dma.hbm_to_vmem [thread:$0]  %s1088_s12, 4096, %s63_s26, [#allocation5], %s837_s28, %s837_s28, %s838_s29  }
  0x19   :  { %829 = dma.done.wait [#allocation3], 4096  }
  0x1a   :  { %830 = vsyncadd [#allocation3], 4294963200 }
  0x1b   :  { %831 = dma.done.wait [#allocation5], 4096  }
  0x1c   :  { %832 = vsyncadd [#allocation5], 4294963200  ;;  %v839_v0 = vmov 0.0   ;;  %v109_v1 = vld [vmem:[#allocation2 + $0xf8] sm:$0xff]  ;;  %v108_v3 = vld [vmem:[#allocation2 + $0xf0] sm:$0xff]  ;;  %vm840_vm0 = vmmov 0  }
  0x1d   :  { %716 = vmatprep.subr.mxu1 %v839_v0  ;;  %v93_v2 = vld [vmem:[#allocation2 + $0x78] sm:$0xff]  ;;  %654 = vmatprep.subr.mxu0 %v109_v1  ;;  %v92_v4 = vld [vmem:[#allocation2 + $0x70] sm:$0xff]  ;;  %v107_v5 = vld [vmem:[#allocation2 + $0xe8] sm:$0xff]  ;;  %vm304_vm1 = vcmask 261120   ;;  %vm631_vm2 = vcmask 25600   ;;  %s843_s24 = smov 126  }
  0x1e   :  { %655 = vmatpush3.msra.mxu0 %v93_v2  ;;  %v91_v6 = vld [vmem:[#allocation2 + $0x68] sm:$0xff]  ;;  %v106_v7 = vld [vmem:[#allocation2 + $0xe0] sm:$0xff]  ;;  %v105_v9 = vld [vmem:[#allocation2 + $0xd8] sm:$0xff]  ;;  %748 = vmatprep.mubr.msk.f32.mxu1 %vm840_vm0, %v839_v0 }
  0x1f   :  { %656 = vmatprep.subr.mxu0 %v108_v3  ;;  %v90_v8 = vld [vmem:[#allocation2 + $0x60] sm:$0xff]  ;;  %v89_v10 = vld [vmem:[#allocation2 + $0x58] sm:$0xff]  ;;  %v104_v11 = vld [vmem:[#allocation2 + $0xd0] sm:$0xff] }
  0x20   :  { %657 = vmatpush3.msra.mxu0 %v92_v4  ;;  %v88_v12 = vld [vmem:[#allocation2 + $0x50] sm:$0xff]  ;;  %v103_v13 = vld [vmem:[#allocation2 + $0xc8] sm:$0xff]  ;;  %v934_v14 = vld.sshfl [vmem:[%s1076_s0] sm:$0x33 pattern:$0x76325410] }
  0x21   :  { %658 = vmatprep.subr.mxu0 %v107_v5  ;;  %v87_v15 = vld [vmem:[#allocation2 + $0x48] sm:$0xff]  ;;  %v125_v16 = vcombine.high %v934_v14, %v934_v14  ;;  %v214_v17 = vld [vmem:[%s1080_s4 + $0x78] sm:$0xff]  ;;  %v102_v18 = vld [vmem:[#allocation2 + $0xc0] sm:$0xff] }
  0x22   :  { %659 = vmatpush3.msra.mxu0 %v91_v6  ;;  %717 = vmatpush3.msra.mxu1 %v214_v17  ;;  %v213_v19 = vld [vmem:[%s1080_s4 + $0x70] sm:$0xff]  ;;  %v86_v20 = vld [vmem:[#allocation2 + $0x40] sm:$0xff]  ;;  %v101_v21 = vld [vmem:[#allocation2 + $0xb8] sm:$0xff] }
  0x23   :  { %660 = vmatprep.subr.mxu0 %v106_v7  ;;  %192 = vmatprep.mubr.f32.mxu0 %v125_v16  ;;  %v212_v22 = vld [vmem:[%s1080_s4 + $0x68] sm:$0xff]  ;;  %v85_v23 = vld [vmem:[#allocation2 + $0x38] sm:$0xff]  ;;  %v100_v24 = vld [vmem:[#allocation2 + $0xb0] sm:$0xff] }
  0x24   :  { %661 = vmatpush3.msra.mxu0 %v90_v8  ;;  %718 = vmatprep.subr.mxu1 %v839_v0  ;;  %v211_v25 = vld [vmem:[%s1080_s4 + $0x60] sm:$0xff]  ;;  %v84_v26 = vld [vmem:[#allocation2 + $0x30] sm:$0xff]  ;;  %v99_v27 = vld [vmem:[#allocation2 + $0xa8] sm:$0xff] }
  0x25   :  { %662 = vmatprep.subr.mxu0 %v105_v9  ;;  %719 = vmatpush3.msra.mxu1 %v213_v19  ;;  %v210_v28 = vld [vmem:[%s1080_s4 + $0x58] sm:$0xff]  ;;  %v83_v29 = vld [vmem:[#allocation2 + $0x28] sm:$0xff]  ;;  %v98_v30 = vld [vmem:[#allocation2 + $0xa0] sm:$0xff]  ;;  %v841_v9 = vmov 1  }
  0x26   :  { %663 = vmatpush3.msra.mxu0 %v89_v10  ;;  %720 = vmatprep.subr.mxu1 %v839_v0  ;;  %v209_v31 = vld [vmem:[%s1080_s4 + $0x50] sm:$0xff]  ;;  %v82_v32 = vld [vmem:[#allocation2 + $0x20] sm:$0xff]  ;;  %v97_v33 = vld [vmem:[#allocation2 + $0x98] sm:$0xff]  ;;  %v842_v10 = vmov 0  }
  0x27   :  { %664 = vmatprep.subr.mxu0 %v104_v11  ;;  %721 = vmatpush3.msra.mxu1 %v212_v22  ;;  %v208_v34 = vld [vmem:[%s1080_s4 + $0x48] sm:$0xff]  ;;  %v81_v35 = vld [vmem:[#allocation2 + $0x18] sm:$0xff]  ;;  %v96_v36 = vld [vmem:[#allocation2 + $0x90] sm:$0xff] }
  0x28   :  { %665 = vmatpush3.msra.mxu0 %v88_v12  ;;  %722 = vmatprep.subr.mxu1 %v839_v0  ;;  %v207_v37 = vld [vmem:[%s1080_s4 + $0x40] sm:$0xff]  ;;  %v80_v38 = vld [vmem:[#allocation2 + $0x10] sm:$0xff]  ;;  %v95_v39 = vld [vmem:[#allocation2 + $0x88] sm:$0xff] }
  0x29   :  { %666 = vmatprep.subr.mxu0 %v103_v13  ;;  %723 = vmatpush3.msra.mxu1 %v211_v25  ;;  %v206_v40 = vld [vmem:[%s1080_s4 + $0x38] sm:$0xff]  ;;  %v79_v41 = vld [vmem:[#allocation2 + $0x8] sm:$0xff]  ;;  %v94_v42 = vld [vmem:[#allocation2 + $0x80] sm:$0xff] }
  0x2a   :  { %667 = vmatpush3.msra.mxu0 %v87_v15  ;;  %724 = vmatprep.subr.mxu1 %v839_v0  ;;  %v205_v43 = vld [vmem:[%s1080_s4 + $0x30] sm:$0xff]  ;;  %v78_v44 = vld [vmem:[#allocation2] sm:$0xff]  ;;  %v204_v45 = vld [vmem:[%s1080_s4 + $0x28] sm:$0xff] }
  0x2b   :  { %668 = vmatprep.subr.mxu0 %v102_v18  ;;  %725 = vmatpush3.msra.mxu1 %v210_v28  ;;  %v203_v46 = vld [vmem:[%s1080_s4 + $0x20] sm:$0xff]  ;;  %v202_v47 = vld [vmem:[%s1080_s4 + $0x18] sm:$0xff]  ;;  %v201_v48 = vld [vmem:[%s1080_s4 + $0x10] sm:$0xff] }
  0x2c   :  { %669 = vmatpush3.msra.mxu0 %v86_v20  ;;  %726 = vmatprep.subr.mxu1 %v839_v0  ;;  %v200_v49 = vld [vmem:[%s1080_s4 + $0x8] sm:$0xff]  ;;  %v199_v50 = vld [vmem:[%s1080_s4] sm:$0xff]  ;;  %v296_v57 = vld [vmem:[%s1082_s6 + $0x18] sm:$0xff] }
  0x2d   :  { %670 = vmatprep.subr.mxu0 %v101_v21  ;;  %727 = vmatpush3.msra.mxu1 %v209_v31  ;;  %v643_v52 = vld [vmem:[%s1079_s3] ss:$0 sm:$0xff]  ;;  %v295_v58 = vld [vmem:[%s1082_s6 + $0x10] sm:$0xff]  ;;  %v294_v59 = vld [vmem:[%s1082_s6 + $0x8] sm:$0xff] }
  0x2e   :  { %671 = vmatpush3.msra.mxu0 %v85_v23  ;;  %728 = vmatprep.subr.mxu1 %v839_v0  ;;  %v293_v60 = vld [vmem:[%s1082_s6] sm:$0xff]  ;;  %v422_v15 = vld [vmem:[%s1086_s10 + $0x18] sm:$0xff]  ;;  %v421_v17 = vld [vmem:[%s1086_s10 + $0x10] sm:$0xff] }
  0x2f   :  { %672 = vmatprep.subr.mxu0 %v100_v24  ;;  %729 = vmatpush3.msra.mxu1 %v208_v34  ;;  %v645_v61 = vld [vmem:[%s1081_s5] ss:$0 sm:$0xff]  ;;  %v420_v18 = vld [vmem:[%s1086_s10 + $0x8] sm:$0xff]  ;;  %v535_v20 = vld [vmem:[#allocation4 + $0xf8] sm:$0xff] }
  0x30   :  { %673 = vmatpush3.msra.mxu0 %v84_v26  ;;  %730 = vmatprep.subr.mxu1 %v839_v0  ;;  %v646_v3 = vld [vmem:[%s1083_s7] ss:$0 sm:$0xff]  ;;  %v534_v21 = vld [vmem:[#allocation4 + $0xf0] sm:$0xff]  ;;  %v533_v22 = vld [vmem:[#allocation4 + $0xe8] sm:$0xff] }
  0x31   :  { %674 = vmatprep.subr.mxu0 %v99_v27  ;;  %731 = vmatpush3.msra.mxu1 %v207_v37  ;;  %v378_v12 = vld [vmem:[%s1077_s1] sm:$0x3]  ;;  %v531_v24 = vld [vmem:[#allocation4 + $0xd8] sm:$0xff]  ;;  %v530_v25 = vld [vmem:[#allocation4 + $0xd0] sm:$0xff] }
  0x32   :  { %675 = vmatpush3.msra.mxu0 %v83_v29  ;;  %732 = vmatprep.subr.mxu1 %v839_v0  ;;  %v419_v19 = vld [vmem:[%s1086_s10] sm:$0xff]  ;;  %v529_v26 = vld [vmem:[#allocation4 + $0xc8] sm:$0xff]  ;;  %v527_v28 = vld [vmem:[#allocation4 + $0xb8] sm:$0xff] }
  0x33   :  { %676 = vmatprep.subr.mxu0 %v98_v30  ;;  %733 = vmatpush3.msra.mxu1 %v206_v40  ;;  %v532_v23 = vld [vmem:[#allocation4 + $0xe0] sm:$0xff]  ;;  %v526_v29 = vld [vmem:[#allocation4 + $0xb0] sm:$0xff]  ;;  %v523_v31 = vld [vmem:[#allocation4 + $0x98] sm:$0xff] }
  0x34   :  { %677 = vmatpush3.msra.mxu0 %v82_v32  ;;  %734 = vmatprep.subr.mxu1 %v839_v0  ;;  %v528_v27 = vld [vmem:[#allocation4 + $0xc0] sm:$0xff]  ;;  %v522_v32 = vld [vmem:[#allocation4 + $0x90] sm:$0xff]  ;;  %v517_v37 = vld [vmem:[#allocation4 + $0x68] sm:$0xff] }
  0x35   :  { %678 = vmatprep.subr.mxu0 %v97_v33  ;;  %735 = vmatpush3.msra.mxu1 %v205_v43  ;;  %v524_v30 = vld [vmem:[#allocation4 + $0xa0] sm:$0xff]  ;;  %v521_v33 = vld [vmem:[#allocation4 + $0x88] sm:$0xff]  ;;  %v514_v40 = vld [vmem:[#allocation4 + $0x50] sm:$0xff] }
  0x36   :  { %679 = vmatpush3.msra.mxu0 %v81_v35  ;;  %736 = vmatprep.subr.mxu1 %v839_v0  ;;  %v520_v34 = vld [vmem:[#allocation4 + $0x80] sm:$0xff]  ;;  %v519_v35 = vld [vmem:[#allocation4 + $0x78] sm:$0xff] }
  0x37   :  { %680 = vmatprep.subr.mxu0 %v96_v36  ;;  %737 = vmatpush3.msra.mxu1 %v204_v45  ;;  %v518_v36 = vld [vmem:[#allocation4 + $0x70] sm:$0xff]  ;;  %v511_v43 = vld [vmem:[#allocation4 + $0x38] sm:$0xff]  ;;  %v509_v45 = vld [vmem:[#allocation4 + $0x28] sm:$0xff] }
  0x38   :  { %681 = vmatpush3.msra.mxu0 %v80_v38  ;;  %738 = vmatprep.subr.mxu1 %v839_v0  ;;  %v516_v38 = vld [vmem:[#allocation4 + $0x60] sm:$0xff] }
  0x39   :  { %682 = vmatprep.subr.mxu0 %v95_v39  ;;  %739 = vmatpush3.msra.mxu1 %v203_v46  ;;  %v515_v39 = vld [vmem:[#allocation4 + $0x58] sm:$0xff]  ;;  %v649_v46 = vld [vmem:[%s1084_s8 + $0x1] ss:$0 sm:$0xff] }
  0x3a   :  { %683 = vmatpush3.msra.mxu0 %v79_v41  ;;  %740 = vmatprep.subr.mxu1 %v839_v0  ;;  %v513_v41 = vld [vmem:[#allocation4 + $0x48] sm:$0xff] }
  0x3b   :  { %684 = vmatprep.subr.mxu0 %v94_v42  ;;  %741 = vmatpush3.msra.mxu1 %v202_v47  ;;  %v512_v42 = vld [vmem:[#allocation4 + $0x40] sm:$0xff] }
  0x3c   :  { %685 = vmatpush3.msra.mxu0 %v78_v44  ;;  %742 = vmatprep.subr.mxu1 %v839_v0  ;;  %v510_v44 = vld [vmem:[#allocation4 + $0x30] sm:$0xff]  ;;  %v648_v47 = vld [vmem:[%s1084_s8] ss:$0 sm:$0xff] }
  0x3d   :  { %193 = vmatmul.mubr.f32.vlgmr.msra.gmra.mxu0 %v934_v14  ;;  %743 = vmatpush3.msra.mxu1 %v201_v48 }
  0x3e   :  { %612 = vmatprep.mubr.f32.mxu0 %v839_v0  ;;  %744 = vmatprep.subr.mxu1 %v839_v0 }
  0x3f   :  { %745 = vmatpush3.msra.mxu1 %v200_v49  ;;  %785 = vset.pattern.permute.xlu1 %v841_v9 }
  0x40   :  { %746 = vmatprep.subr.mxu1 %v839_v0  ;;  %784 = vset.pattern.permute.xlu0 %v842_v10 }
  0x41   :  { %747 = vmatpush3.msra.mxu1 %v199_v50  ;;  %548 = vmatprep.subr.mxu0 %v535_v20 }
  0x42   :  { %751 = vmatprep.subr.mxu1 %v839_v0  ;;  %549 = vmatpush1.msra.mxu0 %v534_v21 }
  0x43   :  { %550 = vmatprep.subr.mxu0 %v533_v22 }
  0x44   :  { %551 = vmatpush1.msra.mxu0 %v532_v23 }
  0x45   :  { %552 = vmatprep.subr.mxu0 %v531_v24 }
  0x46   :  { %553 = vmatpush1.msra.mxu0 %v530_v25 }
  0x47   :  { %554 = vmatprep.subr.mxu0 %v529_v26 }
  0x48   :  { %555 = vmatpush1.msra.mxu0 %v528_v27 }
  0x49   :  { %556 = vmatprep.subr.mxu0 %v527_v28 }
  0x4a   :  { %557 = vmatpush1.msra.mxu0 %v526_v29 }
  0xfd   :  { %v686_v51 = vpop.f32.mrf.mxu0 }
  0xff   :  { %v687_v53 = vpop.f32.mrf.mxu0 }
 0x100   :  { %v688_v54 = vadd.f32 %v687_v53, %v686_v51 }
 0x102   :  { %v195_v55 = vadd.f32 %v688_v54, %v643_v52  ;;  %v650_v52 = vld [vmem:[%s1085_s9] ss:$0 sm:$0xff] }
 0x104   :  { %v198_v56 = vmax.f32 %v195_v55, 0.0 }
 0x106   :  { %749 = vmatmul.mubr.f32.vlgmr.msra.gmra.mxu1 %v198_v56  ;;  %v508_v56 = vld [vmem:[#allocation4 + $0x20] sm:$0xff] }
 0x107   :  { %752 = vmatpush3.msra.mxu1 %v296_v57  ;;  %759 = vmatprep.mubr.msk.f32.mxu1 %vm840_vm0, %v839_v0  ;;  %v507_v57 = vld [vmem:[#allocation4 + $0x18] sm:$0xff] }
 0x108   :  { %753 = vmatprep.subr.mxu1 %v839_v0 }
 0x109   :  { %754 = vmatpush3.msra.mxu1 %v295_v58  ;;  %v506_v58 = vld [vmem:[#allocation4 + $0x10] sm:$0xff] }
 0x10a   :  { %755 = vmatprep.subr.mxu1 %v839_v0 }
 0x10b   :  { %756 = vmatpush3.msra.mxu1 %v294_v59  ;;  %v505_v59 = vld [vmem:[#allocation4 + $0x8] sm:$0xff] }
 0x10c   :  { %757 = vmatprep.subr.mxu1 %v839_v0 }
 0x10d   :  { %758 = vmatpush3.msra.mxu1 %v293_v60  ;;  %v504_v60 = vld [vmem:[#allocation4] sm:$0xff] }
 0x10e   :  { %762 = vmatprep.subr.mxu1 %v839_v0 }
 0x1c6   :  { %v288_v62 = vpop.f32.mrf.mxu1 }
 0x1c7   :  { %v289_v63 = vadd.f32 %v645_v61, %v288_v62  ;;  %v651_v61 = vld [vmem:[%s1087_s11] ss:$0 sm:$0xff] }
 0x1c8   :  { %v750_v1 = vpop.f32.mrf.mxu1 }
 0x1c9   :  { %v292_v2 = vmax.f32 %v289_v63, 0.0 }
 0x1cb   :  { %760 = vmatmul.mubr.msk.f32.vlgmr.msra.gmra.mxu1 %vm304_vm1, %v292_v2 }
 0x1cc   :  { %770 = vmatprep.mubr.msk.f32.mxu1 %vm840_vm0, %v839_v0  ;;  %763 = vmatpush3.msra.mxu1 %v422_v15 }
 0x1cd   :  { %764 = vmatprep.subr.mxu1 %v839_v0 }
 0x1ce   :  { %765 = vmatpush3.msra.mxu1 %v421_v17 }
 0x1cf   :  { %766 = vmatprep.subr.mxu1 %v839_v0 }
 0x1d0   :  { %767 = vmatpush3.msra.mxu1 %v420_v18 }
 0x1d1   :  { %768 = vmatprep.subr.mxu1 %v839_v0  ;;  %v525_v0 = vld [vmem:[#allocation4 + $0xa8] sm:$0xff] }
 0x1d2   :  { %769 = vmatpush3.msra.mxu1 %v419_v19  ;;  %558 = vmatprep.subr.mxu0 %v525_v0 }
 0x1d3   :  { %559 = vmatpush1.msra.mxu0 %v524_v30 }
 0x1d4   :  { %560 = vmatprep.subr.mxu0 %v523_v31 }
 0x1d5   :  { %561 = vmatpush1.msra.mxu0 %v522_v32 }
 0x1d6   :  { %562 = vmatprep.subr.mxu0 %v521_v33 }
 0x1d7   :  { %563 = vmatpush1.msra.mxu0 %v520_v34 }
 0x1d8   :  { %564 = vmatprep.subr.mxu0 %v519_v35 }
 0x1d9   :  { %565 = vmatpush1.msra.mxu0 %v518_v36 }
 0x1da   :  { %566 = vmatprep.subr.mxu0 %v517_v37 }
 0x1db   :  { %567 = vmatpush1.msra.mxu0 %v516_v38 }
 0x1dc   :  { %568 = vmatprep.subr.mxu0 %v515_v39 }
 0x1dd   :  { %569 = vmatpush1.msra.mxu0 %v514_v40 }
 0x1de   :  { %570 = vmatprep.subr.mxu0 %v513_v41 }
 0x1df   :  { %571 = vmatpush1.msra.mxu0 %v512_v42 }
 0x1e0   :  { %572 = vmatprep.subr.mxu0 %v511_v43 }
 0x1e1   :  { %573 = vmatpush1.msra.mxu0 %v510_v44 }
 0x1e2   :  { %574 = vmatprep.subr.mxu0 %v509_v45 }
 0x1e3   :  { %575 = vmatpush1.msra.mxu0 %v508_v56 }
 0x1e4   :  { %576 = vmatprep.subr.mxu0 %v507_v57 }
 0x1e5   :  { %577 = vmatpush1.msra.mxu0 %v506_v58 }
 0x1e6   :  { %578 = vmatprep.subr.mxu0 %v505_v59 }
 0x1e7   :  { %579 = vmatpush1.msra.mxu0 %v504_v60 }
 0x28b   :  { %v374_v4 = vpop.f32.mrf.mxu1 }
 0x28c   :  { %v375_v5 = vadd.f32 %v646_v3, %v374_v4  ;;  %v538_v3 = vlaneseq }
 0x28d   :  { %v761_v6 = vpop.f32.mrf.mxu1 }
 0x28e   :  { %v379_v7 = vmul.f32 0.5, %v375_v5  ;;  %632 = vst.msk [vmem:[%s1091_s15] sm:$0x3] %vm631_vm2, %v375_v5  ;;  %v539_v4 = vshrl.u32 %v538_v3, 7 }
 0x290   :  { %v380_v8 = vmul.f32 1.442695, %v379_v7  ;;  %v544_v6 = vsub.s32 1, %v539_v4  ;;  %v536_v7 = vld [vmem:[%s1089_s13] sm:$0x3] }
 0x292   :  { %787 = vpow2.f32 %v380_v8 }
 0x29f   :  { %v788_v11 = vpop.eup %787 }
 0x2a0   :  { %383 = vrot.lane.b32.xlu0 %v788_v11, %s843_s24 }
 0x312   :  { %v384_v13 = vpop.permute.xlu0 %383 }
 0x313   :  { %v386_v14 = vmul.f32 %v384_v13, %v378_v12 }
 0x315   :  { %v387_v16 = vadd.f32 %v386_v14, %v375_v5  ;;  %v540_v5 = vsub.s32 0, %v539_v4 }
 0x317   :  { %401 = vperm.xlu1 %785, %v387_v16   ;;  %391 = vperm.xlu0 %784, %v387_v16   ;;  %v541_v8 = vrot.slane %v536_v7, %v540_v5 }
 0x31b   :  { %786 = vset.pattern.permute.xlu0 %v841_v9  ;;  %v545_v9 = vrot.slane %v536_v7, %v544_v6 }
 0x392   :  { %v402_v48 = vpop.permute.xlu1 %401  ;;  %v392_v49 = vpop.permute.xlu0 %391 }
 0x393   :  { %v408_v50 = vmul.f32 %v649_v46, %v402_v48  ;;  %v398_v51 = vmul.f32 %v648_v47, %v392_v49 }
 0x395   :  { %v409_v53 = vadd.f32 %v408_v50, %v398_v51 }
 0x397   :  { %v417_v54 = vadd.f32 %v650_v52, %v409_v53 }
 0x399   :  { %v418_v55 = vmax.f32 %v417_v54, 0.0 }
 0x39b   :  { %771 = vmatmul.mubr.msk.f32.vlgmr.msra.gmra.mxu1 %vm304_vm1, %v418_v55 }
 0x45b   :  { %v499_v62 = vpop.f32.mrf.mxu1 }
 0x45c   :  { %v500_v63 = vadd.f32 %v651_v61, %v499_v62 }
 0x45d   :  { %v772_v1 = vpop.f32.mrf.mxu1 }
 0x45e   :  { %v503_v2 = vmax.f32 %v500_v63, 0.0 }
 0x460   :  { %613 = vmatmul.mubr.f32.vlgmr.msra.gmra.mxu0 %v503_v2 }
 0x520   :  { %v614_v10 = vpop.f32.mrf.mxu0 }
 0x521   :  { %v615_v12 = vadd.f32 %v614_v10, %v541_v8 }
 0x522   :  { %v616_v11 = vpop.f32.mrf.mxu0 }
 0x523   :  { %v617_v13 = vadd.f32 %v616_v11, %v545_v9 }
 0x525   :  { %v621_v14 = vcombine.low %v615_v12, %v617_v13 }
 0x527   :  { %653 = vst.sshfl [vmem:[%s1090_s14] sm:$0x33 pattern:$0x76325410] %v621_v14 }
 0x528   :  { %641 = vsyncpa [#allocation3], 1 }
 0x529   :  { %642 = vsyncpa [#allocation5], 1 }

</bundles_post_ra>
